<compile_context>
chip_gen: v7x
topology: tpu7x:2x2x1
jax: 0.10.0
libtpu: 0.0.40
codegen_flags: <defaults>
</compile_context>

<pallas_src>
import jax
import jax.numpy as jnp
from jax.experimental import pallas as pl
from jax.experimental.pallas import tpu as pltpu


def affine_kernel(xT_ref, coef_ref, o_ref):
    # xT_ref : (2, TB) f32 in VMEM  -- batch on the lane axis (lane-dense)
    # coef_ref: (3,)   f32 in SMEM  -- [w_eff[0], w_eff[1], b_eff]
    # o_ref  : (1, TB) f32 in VMEM  -- lane-dense output tile (unmasked stores)
    w0 = coef_ref[0]
    w1 = coef_ref[1]
    b = coef_ref[2]
    x = xT_ref[...]                                    # (2, TB)
    # Pure VPU FMA; K=2 / N=1 is far below MXU granularity, so no jnp.dot here.
    o_ref[...] = x[0:1, :] * w0 + x[1:2, :] * w1 + b   # (1, TB)


def circle_model_v1(x, params, *, tb=512):
    """x: (B, 2) float32. params: w1,b1,w2,b2,w3,b3 with weights as (in, out)."""
    w1, b1 = params["w1"], params["b1"]
    w2, b2 = params["w2"], params["b2"]
    w3, b3 = params["w3"], params["b3"]

    # Collapse the activation-free MLP into a single affine map (exact algebra).
    w_eff = w1 @ w2 @ w3                               # (2, 1)
    b_eff = b1 @ w2 @ w3 + b2 @ w3 + b3                # (1, 1)
    coef = jnp.concatenate(
        [w_eff.reshape(-1), b_eff.reshape(-1)]).astype(jnp.float32)   # (3,)

    x = x.astype(jnp.float32)
    B = x.shape[0]

    # Lane-aligned batch tile; pad batch up to a multiple of TB.
    TB = max(128, (tb // 128) * 128)
    Bp = pl.cdiv(B, TB) * TB
    xT = jnp.pad(x.T, ((0, 0), (0, Bp - B)))           # (2, Bp), batch on lanes

    grid = (Bp // TB,)
    yT = pl.pallas_call(
        affine_kernel,
        out_shape=jax.ShapeDtypeStruct((1, Bp), jnp.float32),
        grid=grid,
        in_specs=[
            # Streamed, auto double-buffered batch tile.
            pl.BlockSpec((2, TB), lambda i: (0, i)),
            # Tiny coefficient vector: whole array in SMEM, read as scalars.
            pl.BlockSpec(memory_space=pltpu.MemorySpace.SMEM),
        ],
        out_specs=pl.BlockSpec((1, TB), lambda i: (0, i)),
        compiler_params=pltpu.CompilerParams(
            # Batch tiles are independent -> shard across TensorCores on v7x.
            dimension_semantics=("parallel",),
        ),
    )(xT, coef)

    return yT[:, :B].T                                 # (B, 1)


def init_params(key):
    """Mimic PyTorch nn.Linear default init: U(-1/sqrt(fan_in), +1/sqrt(fan_in))."""
    dims = [(2, 10), (10, 10), (10, 1)]
    params = {}
    for i, (fan_in, fan_out) in enumerate(dims, start=1):
        key, kw, kb = jax.random.split(key, 3)
        bound = 1.0 / (fan_in ** 0.5)
        params[f"w{i}"] = jax.random.uniform(
            kw, (fan_in, fan_out), jnp.float32, minval=-bound, maxval=bound)
        params[f"b{i}"] = jax.random.uniform(
            kb, (1, fan_out), jnp.float32, minval=-bound, maxval=bound)
    return params


def reference_forward(x, params):
    z = x @ params["w1"] + params["b1"]
    z = z @ params["w2"] + params["b2"]
    z = z @ params["w3"] + params["b3"]
    return z


if __name__ == "__main__":
    key = jax.random.PRNGKey(0)
    key, kx = jax.random.split(key)
    params = init_params(key)

    # Small demo batch of 2-D points (circle-classification input).
    B = 8
    x = jax.random.normal(kx, (B, 2), dtype=jnp.float32)

    out = jax.block_until_ready(circle_model_v1(x, params))
    ref = reference_forward(x, params)
    assert out.shape == (B, 1), out.shape
    assert jnp.allclose(out, ref, atol=1e-5, rtol=1e-5), (out, ref)

    # Also exercise the multi-tile (grid > 1) path with a non-divisible batch.
    key, kx2 = jax.random.split(key)
    B2 = 300
    x2 = jax.random.normal(kx2, (B2, 2), dtype=jnp.float32)
    out2 = jax.block_until_ready(circle_model_v1(x2, params, tb=128))
    ref2 = reference_forward(x2, params)
    assert out2.shape == (B2, 1), out2.shape
    assert jnp.allclose(out2, ref2, atol=1e-5, rtol=1e-5)

    print("KERNEL_OK")
</pallas_src>

<mosaic_0001>
module attributes {stable_mosaic.version = 11 : i64} {
  func.func @affine_kernel(%arg0: i32, %arg1: memref<2x512xf32, #tpu.memory_space<vmem>>, %arg2: memref<3xf32, #tpu.memory_space<smem>>, %arg3: memref<1x512xf32, #tpu.memory_space<vmem>>) attributes {dimension_semantics = [#tpu.dimension_semantics<parallel>], iteration_bounds = array<i64: 1>, scalar_prefetch = 0 : i64, scratch_operands = 0 : i64, tpu.core_type = #tpu.core_type<tc>, window_params = [{transform_indices = @transform_0, window_bounds = array<i64: 2, 512>}, {transform_indices = @transform_1, window_bounds = array<i64: 3>}, {transform_indices = @transform_2, window_bounds = array<i64: 1, 512>}]} {
    %c0 = arith.constant 0 : index
    %0 = memref.load %arg2[%c0] : memref<3xf32, #tpu.memory_space<smem>>
    %c1 = arith.constant 1 : index
    %1 = memref.load %arg2[%c1] : memref<3xf32, #tpu.memory_space<smem>>
    %c2 = arith.constant 2 : index
    %2 = memref.load %arg2[%c2] : memref<3xf32, #tpu.memory_space<smem>>
    %c0_0 = arith.constant 0 : index
    %c0_1 = arith.constant 0 : index
    %3 = vector.load %arg1[%c0_0, %c0_1] : memref<2x512xf32, #tpu.memory_space<vmem>>, vector<2x512xf32>
    %4 = vector.extract_strided_slice %3 {offsets = [0, 0], sizes = [1, 512], strides = [1, 1]} : vector<2x512xf32> to vector<1x512xf32>
    %5 = vector.broadcast %0 : f32 to vector<1x512xf32>
    %6 = arith.mulf %4, %5 : vector<1x512xf32>
    %7 = vector.extract_strided_slice %3 {offsets = [1, 0], sizes = [1, 512], strides = [1, 1]} : vector<2x512xf32> to vector<1x512xf32>
    %8 = vector.broadcast %1 : f32 to vector<1x512xf32>
    %9 = arith.mulf %7, %8 : vector<1x512xf32>
    %10 = arith.addf %6, %9 : vector<1x512xf32>
    %11 = vector.broadcast %2 : f32 to vector<1x512xf32>
    %12 = arith.addf %10, %11 : vector<1x512xf32>
    %c0_2 = arith.constant 0 : index
    %c0_3 = arith.constant 0 : index
    %13 = vector.load %arg3[%c0_2, %c0_3] : memref<1x512xf32, #tpu.memory_space<vmem>>, vector<1x512xf32>
    tpu.vector_store %arg3[%c0_2, %c0_3], %12 {strides = array<i32>} : memref<1x512xf32, #tpu.memory_space<vmem>>, vector<1x512xf32>,
    return
  }
  func.func @transform_0(%arg0: i32) -> (i32, i32) {
    %c0_i32 = arith.constant 0 : i32
    %c0_i32_0 = arith.constant 0 : i32
    return %c0_i32, %arg0 : i32, i32
  }
  func.func @transform_1(%arg0: i32) -> i32 {
    %c0_i32 = arith.constant 0 : i32
    %c0_i32_0 = arith.constant 0 : i32
    return %c0_i32 : i32
  }
  func.func @transform_2(%arg0: i32) -> (i32, i32) {
    %c0_i32 = arith.constant 0 : i32
    %c0_i32_0 = arith.constant 0 : i32
    return %c0_i32, %arg0 : i32, i32
  }
}

</mosaic_0001>

<bundles_post_ra>
// kernel: tpu_custom_call.1
= control target key start
LH: loop header
LB: loop body
LE: loop exit
PB: predicated region body
PF: predicated region fallthrough
CT: control target
= control target key end

     0   :  { %7 = vsyncpa [#allocation3], 0  ;;  %s197_s0 = inlined_call_operand.hbm [shape: f32[2,512], index: 0, kind: input, shape index: {}]   ;;  %s198_s1 = inlined_call_operand.vmem [shape: f32[3], index: 1, kind: input, shape index: {}]   ;;  %s199_s2 = inlined_call_operand.hbm [shape: f32[1,512], index: 2, kind: output, shape index: {}]  }
   0x1   :  { %8 = vsyncpa [#allocation5], 0 }
   0x2   :  { %9 = vsyncpa [#allocation4], 0  ;;  %s26_s11 = sshll.u32 %s198_s1, 4  ;;  %s151_s12 = smov [#allocation2]   ;;  %s27_s11 = int_to_ptr.vmem [resolvable:$true] %s26_s11 }
   0x3   :  { %s16_s13 = sshll.u32 %s151_s12, 4  ;;  %s89_s16 = scalar_lea.hbm %s197_s0, 128  ;;  %s17_s13 = int_to_ptr.vmem [resolvable:$true] %s16_s13 }
   0x4   :  { %p90_p0 = scmp.ne.s32.totalorder %s197_s0, %s89_s16  ;;  %p93_p1 = scmp.lt.u32.totalorder %s89_s16, %s197_s0 }
   0x6   :  { %p95_p2 = pnand %p93_p1, %p90_p0 }
   0x8   :  { %98 = shalt.err (!%p95_p2)
}
   0x9   :  { %s99_s21 = scalar_lea.vmem %s17_s13, 128  ;;  %p104_p4 = scmp.lt.s32.totalorder %s17_s13, %s17_s13 }
   0xa   :  { %p100_p3 = scmp.ne.s32.totalorder %s17_s13, %s99_s21  ;;  %p105_p5 = scmp.lt.s32.totalorder %s99_s21, %s99_s21 }
   0xc   :  { %p106_p6 = por %p105_p5, %p104_p4 }
   0xe   :  { %p107_p7 = pnand %p106_p6, %p100_p3 }
  0x10   :  { %110 = shalt.err (!%p107_p7)
}
  0x11   :  { %19 = dma.hbm_to_vmem [thread:$0]  %s197_s0, 128, %s17_s13, [#allocation3]  }
  0x12   :  { %s111_s23 = scalar_lea.vmem %s27_s11, 16  ;;  %p116_p9 = scmp.lt.s32.totalorder %s27_s11, %s27_s11 }
  0x13   :  { %p112_p8 = scmp.ne.s32.totalorder %s27_s11, %s111_s23  ;;  %p117_p10 = scmp.lt.s32.totalorder %s111_s23, %s111_s23 }
  0x15   :  { %p118_p11 = por %p117_p10, %p116_p9 }
  0x17   :  { %p119_p12 = pnand %p118_p11, %p112_p8 }
  0x19   :  { %122 = shalt.err (!%p119_p12)
}
  0x1a   :  { %s152_s24 = smov [#allocation6]  }
  0x1b   :  { %29 = dma.vmem_to_smem %s27_s11, 16, %s152_s24, [#allocation5]  }
  0x1c   :  { %145 = dma.done.wait [#allocation3], 128  }
  0x1d   :  { %146 = vsyncadd [#allocation3], 4294967168 }
  0x1e   :  { %147 = dma.done.wait [#allocation5], 16  }
  0x1f   :  { %148 = vsyncadd [#allocation5], 4294967280 }
  0x20   :  { %36 = sfence }
  0x21   :  { %s37_s25 = sld [smem:[#allocation6]]  ;;  %s82_s26 = sld [smem:[#allocation6 + $0x1]]  ;;  %v153_v0 = vmov 1966171168   ;;  %v56_v2 = vlaneseq  ;;  %v40_v3 = vld [vmem:[#allocation2] sm:$0xff] }
  0x22   :  { %s83_s27 = sld [smem:[#allocation6 + $0x2]]  ;;  %v54_v1 = vunpack.c.l.s4 %v153_v0  ;;  %s154_s0 = smov [#allocation7]  }
  0x23   :  { %v57_v9 = vshrl.u32 %v56_v2, 7  ;;  %s72_s28 = sshll.u32 %s154_s0, 4  ;;  %vm63_vm0 = vcmp.lt.s32.totalorder %v56_v2, 512  ;;  %s73_s28 = int_to_ptr.vmem [resolvable:$true] %s72_s28 }
  0x24   :  { %v55_v8 = vunpack.c.0.s8 %v54_v1  ;;  %s123_s29 = scalar_lea.vmem %s73_s28, 64  ;;  %p128_p0 = scmp.lt.s32.totalorder %s73_s28, %s73_s28 }
  0x25   :  { %p124_p13 = scmp.ne.s32.totalorder %s73_s28, %s123_s29  ;;  %p129_p1 = scmp.lt.s32.totalorder %s123_s29, %s123_s29 }
  0x26   :  { %v58_v13 = vsub.s32 %v55_v8, %v57_v9 }
  0x27   :  { %v41_v4 = vstv %s37_s25  ;;  %v43_v5 = vstv %s82_s26  ;;  %p130_p2 = por %p129_p1, %p128_p0 }
  0x28   :  { %v42_v6 = vmul.f32 %v41_v4, %v40_v3  ;;  %v44_v7 = vmul.f32 %v43_v5, %v40_v3  ;;  %v50_v11 = vstv %s83_s27 }
  0x29   :  { %p131_p3 = pnand %p130_p2, %p124_p13 }
  0x2a   :  { %v84_v10 = vrot.slane %v44_v7, 9 }
  0x2c   :  { %v49_v12 = vadd.f32 %v84_v10, %v42_v6 }
  0x2e   :  { %v51_v14 = vadd.f32 %v50_v11, %v49_v12 }
  0x30   :  { %v59_v15 = vrot.slane %v51_v14, %v58_v13 }
  0x32   :  { %65 = vst.msk [vmem:[#allocation7] sm:$0xf] %vm63_vm0, %v59_v15 }
  0x33   :  { %134 = shalt.err (!%p131_p3)
}
  0x34   :  { %s135_s4 = scalar_lea.hbm %s199_s2, 64 }
  0x35   :  { %p136_p4 = scmp.ne.s32.totalorder %s199_s2, %s135_s4  ;;  %p139_p5 = scmp.lt.u32.totalorder %s135_s4, %s199_s2 }
  0x37   :  { %p141_p6 = pnand %p139_p5, %p136_p4 }
  0x39   :  { %144 = shalt.err (!%p141_p6)
}
  0x3a   :  { %75 = dma.vmem_to_hbm [thread:$0]  %s73_s28, 64, %s199_s2, [#allocation4]  }
  0x3b   :  { %149 = dma.done.wait [#allocation4], 64  }
  0x3c   :  { %150 = vsyncadd [#allocation4], 4294967232 }
  0x3d   :  { %79 = vsyncpa [#allocation3], 1 }
  0x3e   :  { %80 = vsyncpa [#allocation4], 1 }
  0x3f   :  { %81 = vsyncpa [#allocation5], 1 }

</bundles_post_ra>
